<compile_context>
chip_gen: v7x
topology: tpu7x:2x2x1
jax: 0.10.0
libtpu: 0.0.40
codegen_flags: <defaults>
</compile_context>

<pallas_src>
import math
from functools import partial

import jax
import jax.numpy as jnp
from jax import lax
from jax.experimental import pallas as pl
from jax.experimental.pallas import tpu as pltpu

EPSILON = 1e-07


def _round_up(n, m):
    return ((n + m - 1) // m) * m


def _activate(x, activation):
    # x layout inside the kernel: (rows, C_out) -> the PyTorch softmax(dim=1)
    # (channel axis) is the last (lane) axis here.
    if activation == "linear":
        return x
    if activation == "relu":
        return jnp.maximum(x, 0.0)
    if activation == "sigmoid":
        return jax.nn.sigmoid(x)
    if activation == "softmax":
        return jax.nn.softmax(x, axis=-1)
    raise ValueError(f"unknown activation {activation}")


def _attention_kernel(x_ref, w_ref, b_ref, out_ref, natt_ref, *,
                      bb, t_pad, t_real, c_out_pad,
                      att_activation, cla_activation):
    # x_ref:    (bb*t_pad, c_in_pad)     bf16   rows = (batch, time) pairs, lane = C_in
    # w_ref:    (c_in_pad, 2*c_out_pad)  bf16   [att cols | cla cols], laid out for x @ W
    # b_ref:    (1, 2*c_out_pad)         f32    padded channels carry -1e9
    # out_ref:  (bb, 1, c_out_pad)       f32    lane-dense
    # natt_ref: (bb, t_pad, c_out_pad)   f32    lane-dense

    # Single fused 1x1-conv matmul for both heads and the whole batch block:
    # (bb*t_pad, C_in) @ (C_in, 2*C_out), f32 accumulation on the MXU.
    y = jnp.dot(x_ref[...], w_ref[...],
                preferred_element_type=jnp.float32) + b_ref[...]

    att = _activate(y[:, :c_out_pad], att_activation)          # (bb*t_pad, c_out_pad)
    cla = _activate(y[:, c_out_pad:], cla_activation)           # (bb*t_pad, c_out_pad)

    att = jnp.clip(att, EPSILON, 1.0 - EPSILON)

    # Split the row axis back into (batch, time); t_pad is a multiple of 8 so this
    # reshape is tile-aligned (no relayout).
    att3 = att.reshape(bb, t_pad, c_out_pad)
    cla3 = cla.reshape(bb, t_pad, c_out_pad)

    # Mask the padded time steps so they do not contribute to the T-reduction.
    t_idx = lax.broadcasted_iota(jnp.int32, (1, t_pad, 1), 1)
    att3 = jnp.where(t_idx < t_real, att3, 0.0)

    denom = jnp.sum(att3, axis=1, keepdims=True)                # (bb, 1, c_out_pad)
    inv = pl.reciprocal(denom, approx=True)                     # EUP; safe: denom >= T*eps

    natt_ref[...] = (att3 * inv).astype(natt_ref.dtype)
    out_ref[...] = (jnp.sum(att3 * cla3, axis=1, keepdims=True) * inv).astype(out_ref.dtype)


@partial(jax.jit, static_argnames=("att_activation", "cla_activation", "block_b"))
def attention_forward(x_nchw, w_att, b_att, w_cla, b_cla,
                      att_activation="sigmoid", cla_activation="sigmoid",
                      block_b=8):
    """x_nchw: (B, n_in, T, 1), w_*: (n_out, n_in), b_*: (n_out,).

    Returns (out, norm_att) with out: (B, n_out), norm_att: (B, n_out, T),
    matching the PyTorch module.
    """
    B, C_in, T, Wd = x_nchw.shape
    assert Wd == 1
    n_out = w_att.shape[0]

    # Batch blocking: amortize per-grid-step overhead (bb*T_pad rows per matmul), but
    # keep >= 2 grid steps when B > 1 so the "parallel" axis spans both v7x TensorCores.
    bb = max(1, min(block_b, B))
    if B > 1 and pl.cdiv(B, bb) < 2:
        bb = pl.cdiv(B, 2)
    n_blocks = pl.cdiv(B, bb)
    B_pad = n_blocks * bb

    t_pad = _round_up(T, 8)
    c_in_pad = _round_up(C_in, 8)      # real model: C_in = 2048 -> no-op
    c_out_pad = _round_up(n_out, 8)

    # Lay x out as (B, T, C_in): channels on the lane axis, (batch,time) on rows.
    # transpose + pad + bf16 cast fuse into the one materializing pass XLA must do
    # anyway; the flattening reshape below is free (contiguous leading dims).
    x = jnp.transpose(x_nchw[:, :, :, 0].astype(jnp.float32), (0, 2, 1))   # (B, T, C_in)
    x = jnp.pad(x, ((0, B_pad - B), (0, t_pad - T), (0, c_in_pad - C_in)))
    x = x.astype(jnp.bfloat16).reshape(B_pad * t_pad, c_in_pad)

    # Fused [att | cla] weight, pre-transposed for x @ W (no in-kernel transpose).
    def prep_w(w):
        w = jnp.transpose(w.astype(jnp.float32))                # (n_in, n_out)
        return jnp.pad(w, ((0, c_in_pad - C_in), (0, c_out_pad - n_out)))

    w_cat = jnp.concatenate([prep_w(w_att), prep_w(w_cla)], axis=1).astype(jnp.bfloat16)

    # Padded channels get a -1e9 bias so they are inert for every activation.
    neg = jnp.full((c_out_pad - n_out,), -1e9, jnp.float32)

    def prep_b(bvec):
        return jnp.concatenate([bvec.astype(jnp.float32), neg], axis=0)

    b_cat = jnp.concatenate([prep_b(b_att), prep_b(b_cla)], axis=0).reshape(1, 2 * c_out_pad)

    kernel = partial(_attention_kernel,
                     bb=bb, t_pad=t_pad, t_real=T, c_out_pad=c_out_pad,
                     att_activation=att_activation,
                     cla_activation=cla_activation)

    out_p, natt_p = pl.pallas_call(
        kernel,
        out_shape=(
            jax.ShapeDtypeStruct((B_pad, 1, c_out_pad), jnp.float32),
            jax.ShapeDtypeStruct((B_pad, t_pad, c_out_pad), jnp.float32),
        ),
        grid_spec=pltpu.PrefetchScalarGridSpec(
            num_scalar_prefetch=0,
            grid=(n_blocks,),
            in_specs=[
                pl.BlockSpec((bb * t_pad, c_in_pad), lambda i: (i, 0)),
                pl.BlockSpec((c_in_pad, 2 * c_out_pad), lambda i: (0, 0)),
                pl.BlockSpec((1, 2 * c_out_pad), lambda i: (0, 0)),
            ],
            out_specs=[
                pl.BlockSpec((bb, 1, c_out_pad), lambda i: (i, 0, 0)),
                pl.BlockSpec((bb, t_pad, c_out_pad), lambda i: (i, 0, 0)),
            ],
        ),
        compiler_params=pltpu.CompilerParams(
            dimension_semantics=("parallel",),
            vmem_limit_bytes=48 * 1024 * 1024,
        ),
    )(x, w_cat, b_cat)

    out = out_p[:B, 0, :n_out]                                       # (B, n_out)
    norm_att = jnp.transpose(natt_p[:B, :T, :n_out], (0, 2, 1))      # (B, n_out, T)
    return out, norm_att


def _reference_forward(x_nchw, w_att, b_att, w_cla, b_cla,
                       att_activation="sigmoid", cla_activation="sigmoid",
                       matmul_dtype=jnp.float32):
    # Plain-JAX reference mirroring the PyTorch forward; matmul_dtype lets us
    # match the kernel's bf16-input / f32-accumulate matmul path exactly.
    x = x_nchw[:, :, :, 0].astype(matmul_dtype)                       # (B, C_in, T)
    att = jnp.einsum("oc,bct->bot", w_att.astype(matmul_dtype), x,
                     preferred_element_type=jnp.float32) + b_att[None, :, None]
    cla = jnp.einsum("oc,bct->bot", w_cla.astype(matmul_dtype), x,
                     preferred_element_type=jnp.float32) + b_cla[None, :, None]

    def act(v, a):
        if a == "linear":
            return v
        if a == "relu":
            return jnp.maximum(v, 0.0)
        if a == "sigmoid":
            return jax.nn.sigmoid(v)
        if a == "softmax":
            return jax.nn.softmax(v, axis=1)   # channel dim, as in PyTorch dim=1
        raise ValueError(a)

    att = act(att, att_activation)
    cla = act(cla, cla_activation)
    att = jnp.clip(att, EPSILON, 1.0 - EPSILON)
    norm_att = att / jnp.sum(att, axis=2, keepdims=True)
    out = jnp.sum(norm_att * cla, axis=2)
    return out, norm_att


def _init_layer2_weights(key, n_out, n_in):
    # reproduces init_layer2 for a 1x1 conv: n = n_in * 1 * 1
    n = n_in
    std = math.sqrt(2.0 / n)
    scale = std * math.sqrt(3.0)
    w = jax.random.uniform(key, (n_out, n_in), jnp.float32, minval=-scale, maxval=scale)
    b = jnp.zeros((n_out,), jnp.float32)
    return w, b


if __name__ == "__main__":
    key = jax.random.PRNGKey(0)
    k_x, k_att, k_cla = jax.random.split(key, 3)

    # Small shapes consistent with Attention(n_in, n_out) on a (B, n_in, T, 1) input.
    # (Real ResNetAttention uses n_in=2048, n_out=527, T=33.)
    # Chosen to exercise all padding paths: B not a multiple of the batch block,
    # T not a multiple of 8, n_in / n_out not multiples of 8.
    B, n_in, T, n_out = 5, 20, 33, 12
    att_activation = "sigmoid"
    cla_activation = "sigmoid"

    x = jax.random.normal(k_x, (B, n_in, T, 1), jnp.float32)
    w_att, b_att = _init_layer2_weights(k_att, n_out, n_in)
    w_cla, b_cla = _init_layer2_weights(k_cla, n_out, n_in)

    out, norm_att = attention_forward(x, w_att, b_att, w_cla, b_cla,
                                      att_activation=att_activation,
                                      cla_activation=cla_activation)
    jax.block_until_ready((out, norm_att))

    assert out.shape == (B, n_out)
    assert norm_att.shape == (B, n_out, T)

    # Tight check vs. a reference that matches the kernel's bf16-matmul path.
    ref_out, ref_natt = _reference_forward(x, w_att, b_att, w_cla, b_cla,
                                           att_activation, cla_activation,
                                           matmul_dtype=jnp.bfloat16)
    assert jnp.allclose(out, ref_out, atol=2e-3, rtol=2e-3)
    assert jnp.allclose(norm_att, ref_natt, atol=2e-3, rtol=2e-3)

    # Loose sanity check vs. the full-f32 reference (bf16 matmul inputs only).
    ref_out32, ref_natt32 = _reference_forward(x, w_att, b_att, w_cla, b_cla,
                                               att_activation, cla_activation,
                                               matmul_dtype=jnp.float32)
    assert jnp.allclose(out, ref_out32, atol=5e-2, rtol=5e-2)
    assert jnp.allclose(norm_att, ref_natt32, atol=5e-2, rtol=5e-2)

    print("KERNEL_OK")
</pallas_src>

<mosaic_0001>
module attributes {stable_mosaic.version = 11 : i64} {
  func.func @_attention_kernel(%arg0: i32, %arg1: memref<120x24xbf16, #tpu.memory_space<vmem>>, %arg2: memref<24x32xbf16, #tpu.memory_space<vmem>>, %arg3: memref<1x32xf32, #tpu.memory_space<vmem>>, %arg4: memref<3x1x16xf32, #tpu.memory_space<vmem>>, %arg5: memref<3x40x16xf32, #tpu.memory_space<vmem>>) attributes {dimension_semantics = [#tpu.dimension_semantics<parallel>], iteration_bounds = array<i64: 2>, scalar_prefetch = 0 : i64, scratch_operands = 0 : i64, tpu.core_type = #tpu.core_type<tc>, window_params = [{transform_indices = @transform_0, window_bounds = array<i64: 120, 24>}, {pipeline_mode = #tpu.pipeline_mode<synchronous>, transform_indices = @transform_1, window_bounds = array<i64: 24, 32>}, {pipeline_mode = #tpu.pipeline_mode<synchronous>, transform_indices = @transform_2, window_bounds = array<i64: 1, 32>}, {transform_indices = @transform_3, window_bounds = array<i64: 3, 1, 16>}, {transform_indices = @transform_4, window_bounds = array<i64: 3, 40, 16>}]} {
    %c0 = arith.constant 0 : index
    %c0_0 = arith.constant 0 : index
    %0 = vector.load %arg1[%c0, %c0_0] : memref<120x24xbf16, #tpu.memory_space<vmem>>, vector<120x24xbf16>
    %c0_1 = arith.constant 0 : index
    %c0_2 = arith.constant 0 : index
    %1 = vector.load %arg2[%c0_1, %c0_2] : memref<24x32xbf16, #tpu.memory_space<vmem>>, vector<24x32xbf16>
    %cst = arith.constant dense<0.000000e+00> : vector<120x32xf32>
    %2 = tpu.matmul %0, %1, %cst {dimension_numbers = #tpu.dot_dimension_numbers<[1], [0], [0], [1], [0, 0, 1, 1], [], []>} : vector<120x24xbf16>, vector<24x32xbf16>, vector<120x32xf32> -> vector<120x32xf32>
    %c0_3 = arith.constant 0 : index
    %c0_4 = arith.constant 0 : index
    %3 = vector.load %arg3[%c0_3, %c0_4] : memref<1x32xf32, #tpu.memory_space<vmem>>, vector<1x32xf32>
    %4 = vector.broadcast %3 : vector<1x32xf32> to vector<120x32xf32>
    %5 = arith.addf %2, %4 : vector<120x32xf32>
    %6 = vector.extract_strided_slice %5 {offsets = [0, 0], sizes = [120, 16], strides = [1, 1]} : vector<120x32xf32> to vector<120x16xf32>
    %7 = arith.negf %6 : vector<120x16xf32>
    %8 = math.exp %7 : vector<120x16xf32>
    %cst_5 = arith.constant 1.000000e+00 : f32
    %9 = vector.broadcast %cst_5 : f32 to vector<120x16xf32>
    %10 = arith.addf %9, %8 : vector<120x16xf32>
    %11 = arith.divf %9, %10 : vector<120x16xf32>
    %12 = vector.extract_strided_slice %5 {offsets = [0, 16], sizes = [120, 16], strides = [1, 1]} : vector<120x32xf32> to vector<120x16xf32>
    %13 = arith.negf %12 : vector<120x16xf32>
    %14 = math.exp %13 : vector<120x16xf32>
    %cst_6 = arith.constant 1.000000e+00 : f32
    %15 = vector.broadcast %cst_6 : f32 to vector<120x16xf32>
    %16 = arith.addf %15, %14 : vector<120x16xf32>
    %17 = arith.divf %15, %16 : vector<120x16xf32>
    %cst_7 = arith.constant 1.000000e-07 : f32
    %cst_8 = arith.constant 0.99999988 : f32
    %18 = vector.broadcast %cst_7 : f32 to vector<120x16xf32>
    %19 = arith.maximumf %18, %11 : vector<120x16xf32>
    %20 = vector.broadcast %cst_8 : f32 to vector<120x16xf32>
    %21 = arith.minimumf %20, %19 : vector<120x16xf32>
    %22 = vector.shape_cast %21 : vector<120x16xf32> to vector<3x40x16xf32>
    %23 = vector.shape_cast %17 : vector<120x16xf32> to vector<3x40x16xf32>
    %24 = tpu.iota {dimensions = array<i32: 1>} : vector<1x40x1xi32>
    %c33_i32 = arith.constant 33 : i32
    %25 = vector.broadcast %c33_i32 : i32 to vector<1x40x1xi32>
    %26 = arith.cmpi slt, %24, %25 : vector<1x40x1xi32>
    %cst_9 = arith.constant 0.000000e+00 : f32
    %27 = vector.shape_cast %26 : vector<1x40x1xi1> to vector<1x40x1xi1>
    %28 = vector.broadcast %27 : vector<1x40x1xi1> to vector<3x40x16xi1>
    %29 = vector.broadcast %cst_9 : f32 to vector<3x40x16xf32>
    %30 = arith.select %28, %22, %29 : vector<3x40x16xi1>, vector<3x40x16xf32>
    %cst_10 = arith.constant dense<0.000000e+00> : vector<3x16xf32>
    %31 = vector.multi_reduction <add>, %30, %cst_10 [1] : vector<3x40x16xf32> to vector<3x16xf32>
    %32 = vector.shape_cast %31 : vector<3x16xf32> to vector<3x1x16xf32>
    %33 = tpu.reciprocal %32 {approx = true} : vector<3x1x16xf32> -> vector<3x1x16xf32>
    %34 = vector.broadcast %33 : vector<3x1x16xf32> to vector<3x40x16xf32>
    %35 = arith.mulf %30, %34 : vector<3x40x16xf32>
    %c0_11 = arith.constant 0 : index
    %c0_12 = arith.constant 0 : index
    %c0_13 = arith.constant 0 : index
    %36 = vector.load %arg5[%c0_11, %c0_12, %c0_13] : memref<3x40x16xf32, #tpu.memory_space<vmem>>, vector<3x40x16xf32>
    tpu.vector_store %arg5[%c0_11, %c0_12, %c0_13], %35 {strides = array<i32>} : memref<3x40x16xf32, #tpu.memory_space<vmem>>, vector<3x40x16xf32>,
    %37 = arith.mulf %30, %23 : vector<3x40x16xf32>
    %cst_14 = arith.constant dense<0.000000e+00> : vector<3x16xf32>
    %38 = vector.multi_reduction <add>, %37, %cst_14 [1] : vector<3x40x16xf32> to vector<3x16xf32>
    %39 = vector.shape_cast %38 : vector<3x16xf32> to vector<3x1x16xf32>
    %40 = arith.mulf %39, %33 : vector<3x1x16xf32>
    %c0_15 = arith.constant 0 : index
    %c0_16 = arith.constant 0 : index
    %c0_17 = arith.constant 0 : index
    %41 = vector.load %arg4[%c0_15, %c0_16, %c0_17] : memref<3x1x16xf32, #tpu.memory_space<vmem>>, vector<3x1x16xf32>
    tpu.vector_store %arg4[%c0_15, %c0_16, %c0_17], %40 {strides = array<i32>} : memref<3x1x16xf32, #tpu.memory_space<vmem>>, vector<3x1x16xf32>,
    return
  }
  func.func @transform_0(%arg0: i32) -> (i32, i32) {
    %c0_i32 = arith.constant 0 : i32
    %c0_i32_0 = arith.constant 0 : i32
    return %arg0, %c0_i32 : i32, i32
  }
  func.func @transform_1(%arg0: i32) -> (i32, i32) {
    %c0_i32 = arith.constant 0 : i32
    %c0_i32_0 = arith.constant 0 : i32
    %c0_i32_1 = arith.constant 0 : i32
    return %c0_i32, %c0_i32_0 : i32, i32
  }
  func.func @transform_2(%arg0: i32) -> (i32, i32) {
    %c0_i32 = arith.constant 0 : i32
    %c0_i32_0 = arith.constant 0 : i32
    %c0_i32_1 = arith.constant 0 : i32
    return %c0_i32, %c0_i32_0 : i32, i32
  }
  func.func @transform_3(%arg0: i32) -> (i32, i32, i32) {
    %c0_i32 = arith.constant 0 : i32
    %c0_i32_0 = arith.constant 0 : i32
    %c0_i32_1 = arith.constant 0 : i32
    return %arg0, %c0_i32, %c0_i32_0 : i32, i32, i32
  }
  func.func @transform_4(%arg0: i32) -> (i32, i32, i32) {
    %c0_i32 = arith.constant 0 : i32
    %c0_i32_0 = arith.constant 0 : i32
    %c0_i32_1 = arith.constant 0 : i32
    return %arg0, %c0_i32, %c0_i32_0 : i32, i32, i32
  }
}

</mosaic_0001>

<bundles_post_ra>
// kernel: attention_forward.1
= control target key start
LH: loop header
LB: loop body
LE: loop exit
PB: predicated region body
PF: predicated region fallthrough
CT: control target
= control target key end

     0   :  { %s1060_s15 = smov 0   ;;  %s1315_s0 = inlined_call_operand.vmem [shape: bf16[240,24], index: 0, kind: input, shape index: {}]   ;;  %s1316_s1 = inlined_call_operand.vmem [shape: bf16[24,32], index: 1, kind: input, shape index: {}]   ;;  %s1317_s2 = inlined_call_operand.vmem [shape: f32[1,32], index: 2, kind: input, shape index: {}]   ;;  %s1318_s3 = inlined_call_operand.vmem [shape: f32[6,1,16], index: 3, kind: output, shape index: {0}]   ;;  %s1319_s4 = inlined_call_operand.vmem [shape: f32[6,40,16], index: 4, kind: output, shape index: {1}]  }
   0x1 LB: > { %s861_s16 = sadd.s32 4294967295, %s1032_s15   ;;  %p865_p0 = scmp.ge.s32.totalorder %s1032_s15, 1  ;;  %s1032_s15 = sphi %s1060_s15, %s15_s15  }
   0x2   : > { %p166_p1 = scmp.lt.s32.totalorder %s1032_s15, 3 }
   0x4   : > { %p167_p2 = pnand %p865_p0, %p166_p1 }
   0x5   : > { %v950_v0 = vld [vmem:[%s1316_s1] sm:$0xff] (!%p167_p2)   ;;  %v951_v1 = vld [vmem:[%s1316_s1 + $0x8] ss:$0 sps:$4 sm:$0xff] (!%p167_p2)   ;;  %vm313_vm0 = vcmask (!%p167_p2), 1043456   ;;  %s197_s21 = smul.u32 (!%p167_p2), 15, %s861_s16  ;;  %vm288_vm1 = vcmask (!%p167_p2), 195584  }
   0x6   : > { %170 = sbr.rel (%p167_p2) target bundleno = 427 (0x1ab), region = 32  ;;  %914 = vmatprep.subr.bf16.mxu0 (!%p167_p2), %v950_v0  ;;  %934 = vmatprep.subr.bf16.mxu1 (!%p167_p2), %v950_v0  ;;  %v315_v2 = vsel (!%p167_p2), %vm313_vm0, %v951_v1, 0  ;;  %v1090_v11 = vld [vmem:[%s1317_s2] ss:$0 sm:$0xff] (!%p167_p2)  ;;  %s1034_s28 = smov (!%p167_p2), 112   ;;  %vm569_vm2 = vcmask (!%p167_p2), 130048  }
   0x7   : > { %915 = vmatpush3.bf16.msra.mxu0 (!%p167_p2), %v950_v0  ;;  %936 = vmatpush3.bf16.msra.mxu1 (!%p167_p2), %v950_v0  ;;  %p198_p3 = scmp.lt.s32.totalorder (!%p167_p2), %s197_s21, 29  ;;  %s203_s29 = smul.u32 (!%p167_p2), 3, %s861_s16  ;;  %vm771_vm4 = vcmask (!%p167_p2), 122880  }
   0x8   : > { %938 = vmatprep.subr.msk.bf16.mxu0 (!%p167_p2), %vm313_vm0, %v951_v1  ;;  %939 = vmatprep.subr.msk.bf16.mxu1 (!%p167_p2), %vm313_vm0, %v951_v1 }
   0x9   : > { %p204_p4 = scmp.lt.s32.totalorder (!%p167_p2), %s203_s29, 5 }
   0xb   : > { %917 = vmatpush3.bf16.msra.mxu0 (!%p167_p2), %v315_v2  ;;  %937 = vmatpush3.bf16.msra.mxu1 (!%p167_p2), %v315_v2 }
   0xd   : > { %s1321_s21 = smov (!%p198_p3, %s197_s21), 29  ;;  %s1323_s29 = smov (!%p204_p4, %s203_s29), 5 }
   0xe   : > { %s866_s22 = sshll.u32 %s1321_s21, 2  ;;  %s940_s30 = smul.u32 40, %s1323_s29 }
   0xf   : > { %s201_s25 = scalar_lea.vmem %s1315_s0, %s866_s22  ;;  %s206_s10 = scalar_lea.vmem %s1318_s3, %s1323_s29 }
  0x10   : > { %v952_v3 = vld [vmem:[%s201_s25] sm:$0xff]   ;;  %v954_v5 = vld [vmem:[%s201_s25 + $0x8] sm:$0xff]   ;;  %v956_v7 = vld [vmem:[%s201_s25 + $0x10] sm:$0xff]   ;;  %s1209_s7 = scalar_lea.vmem %s1319_s4, %s940_s30 }
  0x11   : > { %v953_v4 = vld [vmem:[%s201_s25 + $0x20] sm:$0xff]   ;;  %918 = vmatprep.mubr.msk.bf16.mxu0 %vm288_vm1, %v952_v3  ;;  %v955_v6 = vld [vmem:[%s201_s25 + $0x28] sm:$0xff]   ;;  %v957_v8 = vld [vmem:[%s201_s25 + $0x30] sm:$0xff]  }
  0x12   : > { %926 = vmatprep.mubr.msk.bf16.mxu1 %vm288_vm1, %v953_v4  ;;  %919 = vmatmul.mubr.msk.bf16.vlgmr.msra.gmra.mrb[0].mxu0 %vm288_vm1, %v954_v5  ;;  %v958_v9 = vld [vmem:[%s201_s25 + $0x18] sm:$0xff]  }
  0x13   : > { %927 = vmatmul.mubr.msk.bf16.vlgmr.msra.gmra.mrb[0].mxu1 %vm288_vm1, %v955_v6  ;;  %922 = vmatprep.mubr.msk.bf16.mxu0 %vm288_vm1, %v956_v7  ;;  %v959_v10 = vld [vmem:[%s201_s25 + $0x38] ss:$0 sps:$4 sm:$0xff]  }
  0x14   : > { %930 = vmatprep.mubr.msk.bf16.mxu1 %vm288_vm1, %v957_v8 }
  0x1a   : > { %923 = vmatmul.mubr.msk.bf16.gmra.mrb[4].mxu0 %vm288_vm1, %v958_v9 }
  0x1b   : > { %931 = vmatmul.mubr.msk.bf16.gmra.mrb[4].mxu1 %vm288_vm1, %v959_v10 }
  0xe5   : > { %v920_v12 = vpop.f32.mrb[0].mxu0 }
  0xe6   : > { %v360_v13 = vadd.f32 %v920_v12, %v1090_v11  ;;  %v928_v14 = vpop.f32.mrb[0].mxu1  ;;  %v351_v15 = vpop.f32.mrb[1].mxu0 }
  0xe7   : > { %v392_v16 = vadd.f32 %v928_v14, %v1090_v11  ;;  %v352_v17 = vadd.f32 %v1090_v11, %v351_v15  ;;  %v383_v18 = vpop.f32.mrb[1].mxu1  ;;  %v921_v19 = vpop.f32.mrb[2].mxu0 }
  0xe8   : > { %v889_v20 = vmul.f32 -1.442695, %v360_v13  ;;  %v384_v21 = vadd.f32 %v1090_v11, %v383_v18  ;;  %v363_v22 = vadd.f32 %v921_v19, %v1090_v11  ;;  %v929_v23 = vpop.f32.mrb[2].mxu1  ;;  %v354_v24 = vpop.f32.mrb[3].mxu0 }
  0xe9   : > { %v897_v25 = vmul.f32 -1.442695, %v392_v16  ;;  %v887_v26 = vmul.f32 -1.442695, %v352_v17  ;;  %v395_v27 = vadd.f32 %v929_v23, %v1090_v11  ;;  %v355_v28 = vadd.f32 %v1090_v11, %v354_v24  ;;  %v386_v29 = vpop.f32.mrb[3].mxu1 }
  0xea   : > { %960 = vpow2.f32 %v889_v20  ;;  %v890_v30 = vmul.f32 -1.442695, %v363_v22  ;;  %v895_v33 = vmul.f32 -1.442695, %v384_v21  ;;  %v387_v50 = vadd.f32 %v1090_v11, %v386_v29 }
  0xeb   : > { %962 = vpow2.f32 %v897_v25  ;;  %v898_v31 = vmul.f32 -1.442695, %v395_v27  ;;  %v888_v32 = vmul.f32 -1.442695, %v355_v28 }
  0xec   : > { %964 = vpow2.f32 %v887_v26  ;;  %v896_v58 = vmul.f32 -1.442695, %v387_v50 }
  0xed   : > { %v924_v34 = vpop.f32.mrb[4].mxu0  ;;  %966 = vpow2.f32 %v890_v30 }
  0xee   : > { %v376_v35 = vadd.f32 %v924_v34, %v1090_v11  ;;  %v932_v36 = vpop.f32.mrb[4].mxu1  ;;  %v367_v37 = vpop.f32.mrb[5].mxu0  ;;  %968 = vpow2.f32 %v898_v31 }
  0xef   : > { %v408_v38 = vadd.f32 %v932_v36, %v1090_v11  ;;  %v368_v39 = vadd.f32 %v1090_v11, %v367_v37  ;;  %v399_v40 = vpop.f32.mrb[5].mxu1  ;;  %v925_v41 = vpop.f32.mrb[6].mxu0  ;;  %970 = vpow2.f32 %v888_v32 }
  0xf0   : > { %v893_v42 = vmul.f32 -1.442695, %v376_v35  ;;  %v400_v43 = vadd.f32 %v1090_v11, %v399_v40  ;;  %v379_v44 = vadd.f32 %v925_v41, %v1090_v11  ;;  %v933_v45 = vpop.f32.mrb[6].mxu1  ;;  %v370_v46 = vpop.f32.mrb[7].mxu0  ;;  %972 = vpow2.f32 %v895_v33 }
  0xf1   : > { %v901_v47 = vmul.f32 -1.442695, %v408_v38  ;;  %v891_v48 = vmul.f32 -1.442695, %v368_v39  ;;  %v402_v49 = vpop.f32.mrb[7].mxu1  ;;  %v371_v4 = vadd.f32 %v1090_v11, %v370_v46 }
  0xf2   : > { %974 = vpow2.f32 %v893_v42  ;;  %v899_v51 = vmul.f32 -1.442695, %v400_v43  ;;  %v894_v52 = vmul.f32 -1.442695, %v379_v44  ;;  %v403_v6 = vadd.f32 %v1090_v11, %v402_v49 }
  0xf3   : > { %976 = vpow2.f32 %v901_v47  ;;  %v892_v14 = vmul.f32 -1.442695, %v371_v4  ;;  %v533_v11 = vlaneseq }
  0xf4   : > { %v961_v53 = vpop.eup %960  ;;  %978 = vpow2.f32 %v891_v48  ;;  %v900_v16 = vmul.f32 -1.442695, %v403_v6 }
  0xf5   : > { %v963_v54 = vpop.eup %962  ;;  %v460_v55 = vadd.f32 1.0, %v961_v53  ;;  %980 = vpow2.f32 %v899_v51  ;;  %v534_v29 = vshrl.u32 %v533_v11, 7 }
  0xf6   : > { %v965_v56 = vpop.eup %964  ;;  %v468_v57 = vadd.f32 1.0, %v963_v54  ;;  %982 = vpow2.f32 %v894_v52 }
  0xf7   : > { %984 = vrcp.f32 %v460_v55  ;;  %v458_v59 = vadd.f32 1.0, %v965_v56  ;;  %v967_v60 = vpop.eup %966  ;;  %v1123_v37 = vadd.s32 32, %v534_v29 }
  0xf8   : > { %986 = vrcp.f32 %v468_v57  ;;  %v969_v61 = vpop.eup %968  ;;  %v461_v62 = vadd.f32 1.0, %v967_v60 }
  0xf9   : > { %988 = vrcp.f32 %v458_v59  ;;  %v971_v63 = vpop.eup %970  ;;  %v469_v0 = vadd.f32 1.0, %v969_v61  ;;  %vm543_vm3 = vcmp.lt.s32.totalorder %v1123_v37, 33 }
  0xfa   : > { %990 = vpow2.f32 %v896_v58  ;;  %v973_v1 = vpop.eup %972  ;;  %v459_v2 = vadd.f32 1.0, %v971_v63 }
  0xfb   : > { %992 = vrcp.f32 %v461_v62  ;;  %v466_v10 = vadd.f32 1.0, %v973_v1 }
  0xfc   : > { %v975_v3 = vpop.eup %974  ;;  %994 = vrcp.f32 %v469_v0 }
  0xfd   : > { %v977_v5 = vpop.eup %976  ;;  %996 = vrcp.f32 %v459_v2  ;;  %v464_v8 = vadd.f32 1.0, %v975_v3 }
  0xfe   : > { %v979_v7 = vpop.eup %978  ;;  %v472_v25 = vadd.f32 1.0, %v977_v5 }
  0xff   : > { %v981_v9 = vpop.eup %980  ;;  %v462_v12 = vadd.f32 1.0, %v979_v7 }
 0x100   : > { %v983_v13 = vpop.eup %982  ;;  %v470_v18 = vadd.f32 1.0, %v981_v9 }
 0x101   : > { %v985_v15 = vpop.eup %984  ;;  %998 = vrcp.f32 %v462_v12  ;;  %v465_v21 = vadd.f32 1.0, %v983_v13 }
 0x102   : > { %v1107_v17 = vpop.eup %986  ;;  %1000 = vrcp.f32 %v464_v8  ;;  %v505_v22 = vmax.f32 %v985_v15, 1e-07 }
 0x103   : > { %v989_v19 = vpop.eup %988  ;;  %1002 = vrcp.f32 %v466_v10  ;;  %683 = vrot.lane.b32.xlu0 %v1107_v17, %s1034_s28  ;;  %v513_v59 = vmax.f32 %v1107_v17, 1e-07 }
 0x104   : > { %v991_v20 = vpop.eup %990  ;;  %1004 = vpow2.f32 %v892_v14  ;;  %v503_v23 = vmax.f32 %v989_v19, 1e-07  ;;  %v1115_v30 = vmin.f32 %v505_v22, 0.9999999 }
 0x105   : > { %v993_v24 = vpop.eup %992  ;;  %1006 = vpow2.f32 %v900_v16  ;;  %v467_v33 = vadd.f32 1.0, %v991_v20  ;;  %v1151_v2 = vmin.f32 %v513_v59, 0.9999999 }
 0x106   : > { %v995_v26 = vpop.eup %994  ;;  %1008 = vrcp.f32 %v470_v18  ;;  %v1111_v27 = vmin.f32 %v503_v23, 0.9999999  ;;  %v506_v31 = vmax.f32 %v993_v24, 1e-07  ;;  %v573_v39 = vsel %vm569_vm2, %v1115_v30, 0.0 }
 0x107   : > { %v997_v28 = vpop.eup %996  ;;  %685 = vrot.lane.b32.xlu1 %v995_v26, %s1034_s28  ;;  %667 = vrot.lane.b32.xlu0 %v985_v15, %s1034_s28  ;;  %1010 = vrcp.f32 %v465_v21  ;;  %v514_v54 = vmax.f32 %v995_v26, 1e-07  ;;  %v600_v13 = vsel %vm569_vm2, %v1151_v2, 0.0 }
 0x108   : > { %v504_v32 = vmax.f32 %v997_v28, 1e-07  ;;  %1012 = vrcp.f32 %v472_v25  ;;  %v570_v34 = vsel %vm569_vm2, %v1111_v27, 0.0  ;;  %v1127_v40 = vmin.f32 %v506_v31, 0.9999999 }
 0x109   : > { %1014 = vrcp.f32 %v467_v33  ;;  %v1148_v62 = vmin.f32 %v514_v54, 0.9999999 }
 0x10a   : > { %v1119_v35 = vmin.f32 %v504_v32, 0.9999999  ;;  %v575_v53 = vsel %vm569_vm2, %v1127_v40, 0.0 }
 0x10b   : > { %v999_v36 = vpop.eup %998  ;;  %669 = vrot.lane.b32.xlu1 %v993_v24, %s1034_s28  ;;  %663 = vrot.lane.b32.xlu0 %v989_v19, %s1034_s28  ;;  %v601_v7 = vsel %vm569_vm2, %v1148_v62, 0.0 }
 0x10c   : > { %v1001_v38 = vpop.eup %1000  ;;  %v571_v41 = vsel %vm569_vm2, %v1119_v35, 0.0  ;;  %v507_v42 = vmax.f32 %v999_v36, 1e-07  ;;  %v602_v18 = vadd.f32 %v601_v7, %v600_v13 }
 0x10d   : > { %v1131_v43 = vpop.eup %1002  ;;  %v572_v44 = vadd.f32 %v571_v41, %v570_v34  ;;  %v509_v0 = vmax.f32 %v1001_v38, 1e-07 }
 0x10e   : > { %v1005_v45 = vpop.eup %1004  ;;  %v522_v46 = vmin.f32 %v507_v42, 0.9999999  ;;  %v511_v19 = vmax.f32 %v1131_v43, 1e-07 }
 0x10f   : > { %v1007_v47 = vpop.eup %1006  ;;  %v463_v48 = vadd.f32 1.0, %v1005_v45  ;;  %675 = vrot.lane.b32.xlu1 %v1001_v38, %s1034_s28  ;;  %679 = vrot.lane.b32.xlu0 %v1131_v43, %s1034_s28  ;;  %v574_v49 = vadd.f32 %v573_v39, %v572_v44  ;;  %v1157_v9 = vmin.f32 %v509_v0, 0.9999999 }
 0x110   : > { %v1009_v50 = vpop.eup %1008  ;;  %v471_v51 = vadd.f32 1.0, %v1007_v47  ;;  %v1139_v52 = vsel %vm543_vm3, %v522_v46, 0.0  ;;  %v1182_v32 = vmin.f32 %v511_v19, 0.9999999 }
 0x111   : > { %1016 = vrcp.f32 %v463_v48  ;;  %v577_v55 = vsel %vm569_vm2, %v1139_v52, 0.0  ;;  %v576_v56 = vadd.f32 %v575_v53, %v574_v49  ;;  %v1011_v57 = vpop.eup %1010  ;;  %v515_v60 = vmax.f32 %v1009_v50, 1e-07 }
 0x112   : > { %1018 = vrcp.f32 %v471_v51  ;;  %v1013_v58 = vpop.eup %1012  ;;  %v510_v6 = vmax.f32 %v1011_v57, 1e-07  ;;  %v586_v23 = vsel %vm569_vm2, %v1157_v9, 0.0  ;;  %v590_v44 = vsel %vm569_vm2, %v1182_v32, 0.0 }
 0x113   : > { %677 = vrot.lane.b32.xlu1 %v1011_v57, %s1034_s28  ;;  %665 = vrot.lane.b32.xlu0 %v997_v28, %s1034_s28  ;;  %v578_v61 = vadd.f32 %v577_v55, %v576_v56  ;;  %v517_v1 = vmax.f32 %v1013_v58, 1e-07  ;;  %v1153_v3 = vmin.f32 %v515_v60, 0.9999999  ;;  %v1015_v5 = vpop.eup %1014 }
 0x114   : > { %v512_v16 = vmax.f32 %v1015_v5, 1e-07  ;;  %v1168_v11 = vmin.f32 %v510_v6, 0.9999999 }
 0x115   : > { %v579_v63 = vrot.slane %v578_v61, 4  ;;  %v532_v10 = vmin.f32 %v517_v1, 0.9999999  ;;  %v603_v14 = vsel %vm569_vm2, %v1153_v3, 0.0 }
 0x116   : > { %v604_v26 = vadd.f32 %v603_v14, %v602_v18  ;;  %v527_v31 = vmin.f32 %v512_v16, 0.9999999  ;;  %v588_v33 = vsel %vm569_vm2, %v1168_v11, 0.0 }
 0x117   : > { %687 = vrot.lane.b32.xlu0 %v1009_v50, %s1034_s28  ;;  %v580_v4 = vadd.f32 %v579_v63, %v578_v61  ;;  %v1176_v25 = vsel %vm543_vm3, %v532_v10, 0.0 }
 0x118   : > { %v607_v39 = vsel %vm569_vm2, %v1176_v25, 0.0  ;;  %v1196_v42 = vsel %vm543_vm3, %v527_v31, 0.0 }
 0x119   : > { %v581_v8 = vrot.slane %v580_v4, 2  ;;  %v592_v47 = vsel %vm569_vm2, %v1196_v42, 0.0 }
 0x11b   : > { %v1017_v12 = vpop.eup %1016  ;;  %671 = vrot.lane.b32.xlu0 %v999_v36, %s1034_s28  ;;  %v582_v15 = vadd.f32 %v581_v8, %v580_v4 }
 0x11c   : > { %v1019_v17 = vpop.eup %1018  ;;  %673 = vrot.lane.b32.xlu1 %v1017_v12, %s1034_s28  ;;  %v508_v20 = vmax.f32 %v1017_v12, 1e-07 }
 0x11d   : > { %v516_v21 = vmax.f32 %v1019_v17, 1e-07  ;;  %v583_v22 = vrot.slane %v582_v15, 1 }
 0x11e   : > { %v1172_v24 = vmin.f32 %v508_v20, 0.9999999 }
 0x11f   : > { %691 = vrot.lane.b32.xlu0 %v1013_v58, %s1034_s28  ;;  %v1179_v28 = vmin.f32 %v516_v21, 0.9999999  ;;  %v584_v29 = vadd.f32 %v583_v22, %v582_v15 }
 0x120   : > { %689 = vrot.lane.b32.xlu1 %v1019_v17, %s1034_s28  ;;  %v585_v34 = vsel %vm569_vm2, %v1172_v24, 0.0 }
 0x121   : > { %v587_v36 = vadd.f32 %v586_v23, %v585_v34  ;;  %1020 = vrcp.f32 %v584_v29  ;;  %v605_v38 = vsel %vm569_vm2, %v1179_v28, 0.0 }
 0x122   : > { %v606_v41 = vadd.f32 %v605_v38, %v604_v26 }
 0x123   : > { %v589_v43 = vadd.f32 %v588_v33, %v587_v36 }
 0x124   : > { %681 = vrot.lane.b32.xlu1 %v1015_v5, %s1034_s28  ;;  %v608_v45 = vadd.f32 %v607_v39, %v606_v41 }
 0x125   : > { %v591_v46 = vadd.f32 %v590_v44, %v589_v43 }
 0x126   : > { %v609_v48 = vrot.slane %v608_v45, 4 }
 0x127   : > { %v593_v49 = vadd.f32 %v592_v47, %v591_v46 }
 0x128   : > { %v610_v50 = vadd.f32 %v609_v48, %v608_v45 }
 0x129   : > { %v594_v51 = vrot.slane %v593_v49, 4 }
 0x12a   : > { %v611_v37 = vrot.slane %v610_v50, 2 }
 0x12b   : > { %v1204_v53 = vpop.eup %1020  ;;  %v595_v54 = vadd.f32 %v594_v51, %v593_v49 }
 0x12c   : > { %v618_v55 = vmul.f32 %v1204_v53, %v1111_v27  ;;  %v619_v56 = vmul.f32 %v1204_v53, %v1119_v35  ;;  %v620_v57 = vmul.f32 %v1204_v53, %v1115_v30  ;;  %v621_v58 = vmul.f32 %v1204_v53, %v1127_v40 }
 0x12d   : > { %v622_v59 = vmul.f32 %v1204_v53, %v1139_v52  ;;  %v596_v60 = vrot.slane %v595_v54, 2  ;;  %v612_v61 = vadd.f32 %v611_v37, %v610_v50 }
 0x12e   : > { %633 = vst.msk [vmem:[%s1209_s7] sm:$0xff] %vm569_vm2, %v618_v55  ;;  %634 = vst.msk [vmem:[%s1209_s7 + $0x8] sm:$0xff] %vm569_vm2, %v619_v56 }
 0x12f   : > { %635 = vst.msk [vmem:[%s1209_s7 + $0x10] sm:$0xff] %vm569_vm2, %v620_v57  ;;  %636 = vst.msk [vmem:[%s1209_s7 + $0x18] sm:$0xff] %vm569_vm2, %v621_v58  ;;  %v597_v63 = vadd.f32 %v596_v60, %v595_v54  ;;  %v613_v0 = vrot.slane %v612_v61, 1 }
 0x130   : > { %637 = vst.msk [vmem:[%s1209_s7 + $0x20] sm:$0xff] %vm569_vm2, %v622_v59 }
 0x131   : > { %v598_v1 = vrot.slane %v597_v63, 1  ;;  %v614_v4 = vadd.f32 %v613_v0, %v612_v61 }
 0x133   : > { %v599_v5 = vadd.f32 %v598_v1, %v597_v63  ;;  %1022 = vrcp.f32 %v614_v4 }
 0x135   : > { %1024 = vrcp.f32 %v599_v5 }
 0x13d   : > { %v1231_v6 = vpop.eup %1022 }
 0x13e   : > { %v628_v7 = vmul.f32 %v1231_v6, %v1151_v2  ;;  %v629_v8 = vmul.f32 %v1231_v6, %v1148_v62  ;;  %v630_v10 = vmul.f32 %v1231_v6, %v1153_v3  ;;  %v631_v12 = vmul.f32 %v1231_v6, %v1179_v28 }
 0x13f   : > { %v1241_v13 = vpop.eup %1024  ;;  %v632_v14 = vmul.f32 %v1231_v6, %v1176_v25 }
 0x140   : > { %v623_v15 = vmul.f32 %v1241_v13, %v1172_v24  ;;  %v624_v16 = vmul.f32 %v1241_v13, %v1157_v9  ;;  %v625_v17 = vmul.f32 %v1241_v13, %v1168_v11  ;;  %v626_v18 = vmul.f32 %v1241_v13, %v1182_v32  ;;  %643 = vst.msk [vmem:[%s1209_s7 + $0x50] sm:$0xff] %vm569_vm2, %v628_v7 }
 0x141   : > { %644 = vst.msk [vmem:[%s1209_s7 + $0x58] sm:$0xff] %vm569_vm2, %v629_v8  ;;  %645 = vst.msk [vmem:[%s1209_s7 + $0x60] sm:$0xff] %vm569_vm2, %v630_v10  ;;  %v627_v19 = vmul.f32 %v1241_v13, %v1196_v42 }
 0x142   : > { %646 = vst.msk [vmem:[%s1209_s7 + $0x68] sm:$0xff] %vm569_vm2, %v631_v12  ;;  %647 = vst.msk [vmem:[%s1209_s7 + $0x70] sm:$0xff] %vm569_vm2, %v632_v14 }
 0x143   : > { %638 = vst.msk [vmem:[%s1209_s7 + $0x28] sm:$0xff] %vm569_vm2, %v623_v15  ;;  %639 = vst.msk [vmem:[%s1209_s7 + $0x30] sm:$0xff] %vm569_vm2, %v624_v16 }
 0x144   : > { %640 = vst.msk [vmem:[%s1209_s7 + $0x38] sm:$0xff] %vm569_vm2, %v625_v17  ;;  %641 = vst.msk [vmem:[%s1209_s7 + $0x40] sm:$0xff] %vm569_vm2, %v626_v18 }
 0x145   : > { %642 = vst.msk [vmem:[%s1209_s7 + $0x48] sm:$0xff] %vm569_vm2, %v627_v19 }
 0x175   : > { %v684_v20 = vpop.permute.xlu0 %683 }
 0x176   : > { %v718_v47 = vmul.f32 %v684_v20, %v1151_v2 }
 0x178   : > { %v753_v37 = vsel %vm569_vm2, %v718_v47, 0.0 }
 0x179   : > { %v686_v21 = vpop.permute.xlu1 %685  ;;  %v668_v22 = vpop.permute.xlu0 %667 }
 0x17a   : > { %v710_v36 = vmul.f32 %v668_v22, %v1115_v30  ;;  %v719_v44 = vmul.f32 %v686_v21, %v1148_v62 }
 0x17c   : > { %v726_v48 = vsel %vm569_vm2, %v710_v36, 0.0 }
 0x17d   : > { %v670_v23 = vpop.permute.xlu1 %669  ;;  %v664_v26 = vpop.permute.xlu0 %663 }
 0x17e   : > { %v708_v33 = vmul.f32 %v664_v26, %v1111_v27  ;;  %v711_v27 = vmul.f32 %v670_v23, %v1127_v40 }
 0x180   : > { %v723_v39 = vsel %vm569_vm2, %v708_v33, 0.0  ;;  %v728_v62 = vsel %vm569_vm2, %v711_v27, 0.0 }
 0x181   : > { %v680_v29 = vpop.permute.xlu0 %679  ;;  %v676_v31 = vpop.permute.xlu1 %675 }
 0x182   : > { %v714_v50 = vmul.f32 %v676_v31, %v1157_v9 }
 0x184   : > { %v739_v9 = vsel %vm569_vm2, %v714_v50, 0.0 }
 0x185   : > { %v666_v34 = vpop.permute.xlu0 %665  ;;  %v678_v41 = vpop.permute.xlu1 %677 }
 0x186   : > { %v709_v38 = vmul.f32 %v666_v34, %v1119_v35  ;;  %v754_v35 = vsel %vm569_vm2, %v719_v44, 0.0  ;;  %v715_v2 = vmul.f32 %v678_v41, %v1168_v11  ;;  %v716_v11 = vmul.f32 %v680_v29, %v1182_v32 }
 0x188   : > { %v724_v43 = vsel %vm569_vm2, %v709_v38, 0.0  ;;  %v743_v16 = vsel %vm569_vm2, %v716_v11, 0.0 }
 0x189   : > { %v725_v45 = vadd.f32 %v724_v43, %v723_v39  ;;  %v688_v46 = vpop.permute.xlu0 %687 }
 0x18a   : > { %v720_v30 = vmul.f32 %v688_v46, %v1153_v3  ;;  %v755_v3 = vadd.f32 %v754_v35, %v753_v37 }
 0x18b   : > { %v727_v49 = vadd.f32 %v726_v48, %v725_v45 }
 0x18c   : > { %v756_v40 = vsel %vm569_vm2, %v720_v30, 0.0 }
 0x18d   : > { %v672_v51 = vpop.permute.xlu0 %671  ;;  %v729_v57 = vadd.f32 %v728_v62, %v727_v49  ;;  %v757_v0 = vadd.f32 %v756_v40, %v755_v3 }
 0x18e   : > { %v674_v54 = vpop.permute.xlu1 %673  ;;  %v712_v55 = vmul.f32 %v672_v51, %v1139_v52 }
 0x18f   : > { %v713_v56 = vmul.f32 %v674_v54, %v1172_v24  ;;  %v741_v24 = vsel %vm569_vm2, %v715_v2, 0.0 }
 0x190   : > { %v730_v58 = vsel %vm569_vm2, %v712_v55, 0.0 }
 0x191   : > { %v738_v59 = vsel %vm569_vm2, %v713_v56, 0.0  ;;  %v731_v60 = vadd.f32 %v730_v58, %v729_v57  ;;  %v692_v61 = vpop.permute.xlu0 %691 }
 0x192   : > { %v740_v63 = vadd.f32 %v739_v9, %v738_v59  ;;  %v690_v1 = vpop.permute.xlu1 %689  ;;  %v722_v52 = vmul.f32 %v692_v61, %v1176_v25 }
 0x193   : > { %v721_v4 = vmul.f32 %v690_v1, %v1179_v28  ;;  %v732_v5 = vrot.slane %v731_v60, 4 }
 0x194   : > { %v742_v7 = vadd.f32 %v741_v24, %v740_v63  ;;  %v760_v12 = vsel %vm569_vm2, %v722_v52, 0.0 }
 0x195   : > { %v758_v8 = vsel %vm569_vm2, %v721_v4, 0.0  ;;  %v733_v10 = vadd.f32 %v732_v5, %v731_v60 }
 0x196   : > { %v759_v14 = vadd.f32 %v758_v8, %v757_v0  ;;  %v682_v15 = vpop.permute.xlu1 %681  ;;  %v744_v32 = vadd.f32 %v743_v16, %v742_v7 }
 0x197   : > { %v734_v17 = vrot.slane %v733_v10, 2  ;;  %v717_v25 = vmul.f32 %v682_v15, %v1196_v42 }
 0x198   : > { %v761_v18 = vadd.f32 %v760_v12, %v759_v14 }
 0x199   : > { %v735_v19 = vadd.f32 %v734_v17, %v733_v10  ;;  %v745_v28 = vsel %vm569_vm2, %v717_v25, 0.0 }
 0x19a   : > { %v746_v20 = vadd.f32 %v745_v28, %v744_v32  ;;  %v762_v21 = vrot.slane %v761_v18, 4 }
 0x19b   : > { %v736_v22 = vrot.slane %v735_v19, 1 }
 0x19c   : > { %v747_v23 = vrot.slane %v746_v20, 4  ;;  %v763_v26 = vadd.f32 %v762_v21, %v761_v18 }
 0x19d   : > { %v737_v29 = vadd.f32 %v736_v22, %v735_v19 }
 0x19e   : > { %v748_v31 = vadd.f32 %v747_v23, %v746_v20  ;;  %v764_v33 = vrot.slane %v763_v26, 2 }
 0x19f   : > { %v768_v42 = vmul.f32 %v1204_v53, %v737_v29 }
 0x1a0   : > { %v749_v34 = vrot.slane %v748_v31, 2  ;;  %v765_v36 = vadd.f32 %v764_v33, %v763_v26 }
 0x1a1   : > { %772 = vst.msk [vmem:[%s206_s10] sm:$0x1] %vm771_vm4, %v768_v42 }
 0x1a2   : > { %v750_v38 = vadd.f32 %v749_v34, %v748_v31  ;;  %v766_v39 = vrot.slane %v765_v36, 1 }
 0x1a4   : > { %v751_v41 = vrot.slane %v750_v38, 1  ;;  %v767_v43 = vadd.f32 %v766_v39, %v765_v36 }
 0x1a6   : > { %v752_v44 = vadd.f32 %v751_v41, %v750_v38  ;;  %v770_v45 = vmul.f32 %v1231_v6, %v767_v43 }
 0x1a8   : > { %v769_v46 = vmul.f32 %v1241_v13, %v752_v44  ;;  %774 = vst.msk [vmem:[%s206_s10 + $0x2] sm:$0x1] %vm771_vm4, %v770_v45 }
 0x1aa   : > { %773 = vst.msk [vmem:[%s206_s10 + $0x1] sm:$0x1] %vm771_vm4, %v769_v46 }
 0x1ab PF: > { %s15_s15 = sadd.s32 1, %s1032_s15  }
 0x1ac   : > { %p12_p5 = scmp.ge.s32.totalorder %s15_s15, 4  }
 0x1ae   :  { %14 = sbr.rel (!%p12_p5) target bundleno = 1 (0x1), region = 74 }

</bundles_post_ra>
